<compile_context>
chip_gen: v7x
topology: tpu7x:2x2x1
jax: 0.10.0
libtpu: 0.0.40
codegen_flags: <defaults>
</compile_context>

<pallas_src>
import functools

import jax
import jax.numpy as jnp
from jax.experimental import pallas as pl
from jax.experimental.pallas import tpu as pltpu


def _rtfm_loss_kernel(sl_ref, fn_ref, fa_ref, out_ref, acc_ref,
                      *, alpha, margin, n_rows, k):
    # sl_ref:  (4, B)       rows = [score_n, score_a, label_n, label_a]
    # fn_ref:  (bn, K, F)   block of feat_n
    # fa_ref:  (bn, K, F)   block of feat_a
    # out_ref: (1, 1)
    # acc_ref: (1, 1) VMEM scratch accumulating sum((loss_abn + loss_nor)^2)
    i = pl.program_id(0)
    nsteps = pl.num_programs(0)

    @pl.when(i == 0)
    def _():
        acc_ref[...] = jnp.zeros_like(acc_ref)

    fn = fn_ref[...]                                        # (bn, K, F)
    fa = fa_ref[...]                                        # (bn, K, F)
    block_n = fn.shape[0]
    inv_k = 1.0 / float(k)

    # Mean over the K snippets (sublane-axis reduce; K is tiny).
    mean_n = jnp.sum(fn, axis=1) * inv_k                    # (bn, F)
    mean_a = jnp.sum(fa, axis=1) * inv_k                    # (bn, F)

    # Per-row L2 norm over F (lane axis) -> one XLU reduce per slab.
    norm_n = jnp.sqrt(jnp.sum(mean_n * mean_n, axis=-1, keepdims=True))  # (bn, 1)
    norm_a = jnp.sqrt(jnp.sum(mean_a * mean_a, axis=-1, keepdims=True))  # (bn, 1)

    per_row = (jnp.abs(margin - norm_a) + norm_n) ** 2      # (bn, 1)

    # Mask rows past N (only matters when N is not a multiple of the block
    # size, on the last grid step).
    row = jax.lax.broadcasted_iota(jnp.int32, (block_n, 1), 0)
    valid = (i * block_n + row) < n_rows
    acc_ref[...] += jnp.sum(jnp.where(valid, per_row, 0.0), keepdims=True)

    @pl.when(i == nsteps - 1)
    def _():
        sl = sl_ref[...]                                    # (4, B)
        scores = sl[0:2, :]                                 # (2, B)
        labels = sl[2:4, :]                                 # (2, B)
        # torch.nn.BCELoss clamps each log term at -100; keep both log terms
        # so soft (non-binary) labels behave exactly like PyTorch.
        log_s = jnp.maximum(jnp.log(scores), -100.0)
        log_1ms = jnp.maximum(jnp.log(1.0 - scores), -100.0)
        bce = -(labels * log_s + (1.0 - labels) * log_1ms)  # (2, B)
        loss_cls = jnp.sum(bce, keepdims=True) / float(bce.size)   # (1, 1)
        loss_rtfm = acc_ref[...] * (1.0 / float(n_rows))            # (1, 1)
        out_ref[...] = loss_cls + alpha * loss_rtfm


def _choose_block_n(n_rows, k, f):
    """Largest N-block that keeps each double-buffered feature block ~<=4 MiB
    of VMEM (accounting for the (8, 128) layout padding of the (K, F) tile)."""
    pad_k = ((k + 7) // 8) * 8
    pad_f = ((f + 127) // 128) * 128
    bytes_per_row = pad_k * pad_f * 4                 # one tensor, one row, f32
    budget = 4 * 1024 * 1024                          # per buffer; 2 tensors x 2 bufs
    bn = min(n_rows, max(1, budget // max(bytes_per_row, 1)))
    if bn >= n_rows:
        return n_rows                                 # full extent
    return max(8, (bn // 8) * 8) if bn >= 8 else bn


def rtfm_loss(score_normal, score_abnormal, nlabel, alabel, feat_n, feat_a,
              *, alpha=0.0001, margin=100.0):
    """Pallas wrapper. Scores: (B, 1) or (B,); labels: (B,); feats: (N, K, F)."""
    sn = score_normal.astype(jnp.float32).reshape(-1)       # (B,)
    sa = score_abnormal.astype(jnp.float32).reshape(-1)     # (B,)
    nl = nlabel.astype(jnp.float32).reshape(-1)             # (B,)
    al = alabel.astype(jnp.float32).reshape(-1)             # (B,)
    # Fuse the four tiny vectors into one lane-dense (4, B) array -> one DMA.
    sl = jnp.stack([sn, sa, nl, al], axis=0)                # (4, B)

    fn = feat_n.astype(jnp.float32)                         # (N, K, F)
    fa = feat_a.astype(jnp.float32)                         # (N, K, F)
    N, K, F = fn.shape
    B = sn.shape[0]

    bn = _choose_block_n(N, K, F)
    grid = (pl.cdiv(N, bn),)

    kernel = functools.partial(_rtfm_loss_kernel, alpha=float(alpha),
                               margin=float(margin), n_rows=N, k=K)

    out = pl.pallas_call(
        kernel,
        out_shape=jax.ShapeDtypeStruct((1, 1), jnp.float32),
        grid_spec=pltpu.PrefetchScalarGridSpec(
            num_scalar_prefetch=0,
            grid=grid,
            in_specs=[
                pl.BlockSpec((4, B), lambda i: (0, 0)),          # resident
                pl.BlockSpec((bn, K, F), lambda i: (i, 0, 0)),   # feat_n stream
                pl.BlockSpec((bn, K, F), lambda i: (i, 0, 0)),   # feat_a stream
            ],
            out_specs=pl.BlockSpec((1, 1), lambda i: (0, 0)),
            scratch_shapes=[pltpu.VMEM((1, 1), jnp.float32)],
        ),
        compiler_params=pltpu.CompilerParams(
            dimension_semantics=("arbitrary",)),
    )(sl, fn, fa)
    return out[0, 0]


def _rtfm_loss_ref(score_normal, score_abnormal, nlabel, alabel, feat_n, feat_a,
                   *, alpha=0.0001, margin=100.0):
    """Plain-JAX reference mirroring the PyTorch module."""
    label = jnp.concatenate([nlabel, alabel], axis=0).astype(jnp.float32)
    score = jnp.concatenate([score_normal, score_abnormal], axis=0).squeeze()
    log_s = jnp.maximum(jnp.log(score), -100.0)
    log_1ms = jnp.maximum(jnp.log(1.0 - score), -100.0)
    loss_cls = jnp.mean(-(label * log_s + (1.0 - label) * log_1ms))
    loss_abn = jnp.abs(margin - jnp.linalg.norm(jnp.mean(feat_a, axis=1), axis=1))
    loss_nor = jnp.linalg.norm(jnp.mean(feat_n, axis=1), axis=1)
    loss_rtfm = jnp.mean((loss_abn + loss_nor) ** 2)
    return loss_cls + alpha * loss_rtfm


if __name__ == "__main__":
    key = jax.random.PRNGKey(0)
    k1, k2, k3, k4 = jax.random.split(key, 4)

    B = 4       # batch of normal / abnormal scores
    N = 8       # rows in selected feature tensors
    K = 3       # number of selected snippets (mean over this axis)
    F = 128     # feature dimension (lane-dense; L2 norm over this axis)

    # Scores must lie in (0, 1) for BCELoss -> pass through sigmoid.
    score_normal = jax.nn.sigmoid(jax.random.normal(k1, (B, 1), jnp.float32))
    score_abnormal = jax.nn.sigmoid(jax.random.normal(k2, (B, 1), jnp.float32))
    nlabel = jnp.zeros((B,), jnp.float32)
    alabel = jnp.ones((B,), jnp.float32)
    feat_n = jax.random.normal(k3, (N, K, F), jnp.float32)
    feat_a = jax.random.normal(k4, (N, K, F), jnp.float32)

    alpha, margin = 0.0001, 100.0

    loss = rtfm_loss(score_normal, score_abnormal, nlabel, alabel, feat_n, feat_a,
                     alpha=alpha, margin=margin)
    loss = jax.block_until_ready(loss)

    ref = _rtfm_loss_ref(score_normal, score_abnormal, nlabel, alabel,
                         feat_n, feat_a, alpha=alpha, margin=margin)
    ref = jax.block_until_ready(ref)

    assert jnp.allclose(loss, ref, rtol=1e-5, atol=1e-5), (loss, ref)
    print("KERNEL_OK")
</pallas_src>

<mosaic_0001>
module attributes {stable_mosaic.version = 11 : i64} {
  func.func @_rtfm_loss_kernel(%arg0: i32, %arg1: memref<4x4xf32, #tpu.memory_space<vmem>>, %arg2: memref<8x3x128xf32, #tpu.memory_space<vmem>>, %arg3: memref<8x3x128xf32, #tpu.memory_space<vmem>>, %arg4: memref<1x1xf32, #tpu.memory_space<vmem>>, %arg5: memref<1x1xf32, #tpu.memory_space<vmem>>) attributes {dimension_semantics = [#tpu.dimension_semantics<arbitrary>], iteration_bounds = array<i64: 1>, scalar_prefetch = 0 : i64, scratch_operands = 1 : i64, tpu.core_type = #tpu.core_type<tc>, window_params = [{pipeline_mode = #tpu.pipeline_mode<synchronous>, transform_indices = @transform_0, window_bounds = array<i64: 4, 4>}, {transform_indices = @transform_1, window_bounds = array<i64: 8, 3, 128>}, {transform_indices = @transform_2, window_bounds = array<i64: 8, 3, 128>}, {pipeline_mode = #tpu.pipeline_mode<synchronous>, transform_indices = @transform_3, window_bounds = array<i64: 1, 1>}]} {
    %c0_i32 = arith.constant 0 : i32
    %0 = arith.cmpi eq, %arg0, %c0_i32 : i32
    %1 = arith.extui %0 : i1 to i32
    %c0_i32_0 = arith.constant 0 : i32
    %2 = arith.cmpi ne, %1, %c0_i32_0 : i32
    scf.if %2 {
      %cst_21 = arith.constant 0.000000e+00 : f32
      %43 = vector.broadcast %cst_21 : f32 to vector<1x1xf32>
      %c0_22 = arith.constant 0 : index
      %c0_23 = arith.constant 0 : index
      %44 = vector.load %arg5[%c0_22, %c0_23] : memref<1x1xf32, #tpu.memory_space<vmem>>, vector<1x1xf32>
      tpu.vector_store %arg5[%c0_22, %c0_23], %43 {strides = array<i32>} : memref<1x1xf32, #tpu.memory_space<vmem>>, vector<1x1xf32>,
    } else {
    }
    %c0 = arith.constant 0 : index
    %c0_1 = arith.constant 0 : index
    %c0_2 = arith.constant 0 : index
    %3 = vector.load %arg2[%c0, %c0_1, %c0_2] : memref<8x3x128xf32, #tpu.memory_space<vmem>>, vector<8x3x128xf32>
    %c0_3 = arith.constant 0 : index
    %c0_4 = arith.constant 0 : index
    %c0_5 = arith.constant 0 : index
    %4 = vector.load %arg3[%c0_3, %c0_4, %c0_5] : memref<8x3x128xf32, #tpu.memory_space<vmem>>, vector<8x3x128xf32>
    %cst = arith.constant dense<0.000000e+00> : vector<8x128xf32>
    %5 = vector.multi_reduction <add>, %3, %cst [1] : vector<8x3x128xf32> to vector<8x128xf32>
    %cst_6 = arith.constant 0.333333343 : f32
    %6 = vector.broadcast %cst_6 : f32 to vector<8x128xf32>
    %7 = arith.mulf %5, %6 : vector<8x128xf32>
    %cst_7 = arith.constant dense<0.000000e+00> : vector<8x128xf32>
    %8 = vector.multi_reduction <add>, %4, %cst_7 [1] : vector<8x3x128xf32> to vector<8x128xf32>
    %cst_8 = arith.constant 0.333333343 : f32
    %9 = vector.broadcast %cst_8 : f32 to vector<8x128xf32>
    %10 = arith.mulf %8, %9 : vector<8x128xf32>
    %11 = arith.mulf %7, %7 : vector<8x128xf32>
    %cst_9 = arith.constant dense<0.000000e+00> : vector<8xf32>
    %12 = vector.multi_reduction <add>, %11, %cst_9 [1] : vector<8x128xf32> to vector<8xf32>
    %13 = vector.shape_cast %12 : vector<8xf32> to vector<8x1xf32>
    %14 = math.sqrt %13 : vector<8x1xf32>
    %15 = arith.mulf %10, %10 : vector<8x128xf32>
    %cst_10 = arith.constant dense<0.000000e+00> : vector<8xf32>
    %16 = vector.multi_reduction <add>, %15, %cst_10 [1] : vector<8x128xf32> to vector<8xf32>
    %17 = vector.shape_cast %16 : vector<8xf32> to vector<8x1xf32>
    %18 = math.sqrt %17 : vector<8x1xf32>
    %cst_11 = arith.constant 1.000000e+02 : f32
    %19 = vector.broadcast %cst_11 : f32 to vector<8x1xf32>
    %20 = arith.subf %19, %18 : vector<8x1xf32>
    %21 = math.absf %20 : vector<8x1xf32>
    %22 = arith.addf %21, %14 : vector<8x1xf32>
    %23 = arith.mulf %22, %22 : vector<8x1xf32>
    %24 = tpu.iota {dimensions = array<i32: 0>} : vector<8x1xi32>
    %c8_i32 = arith.constant 8 : i32
    %25 = arith.muli %arg0, %c8_i32 : i32
    %26 = vector.broadcast %25 : i32 to vector<8x1xi32>
    %27 = arith.addi %26, %24 : vector<8x1xi32>
    %c8_i32_12 = arith.constant 8 : i32
    %28 = vector.broadcast %c8_i32_12 : i32 to vector<8x1xi32>
    %29 = arith.cmpi slt, %27, %28 : vector<8x1xi32>
    %c0_13 = arith.constant 0 : index
    %c0_14 = arith.constant 0 : index
    %30 = vector.load %arg5[%c0_13, %c0_14] : memref<1x1xf32, #tpu.memory_space<vmem>>, vector<1x1xf32>
    %cst_15 = arith.constant 0.000000e+00 : f32
    %31 = vector.broadcast %cst_15 : f32 to vector<8x1xf32>
    %32 = arith.select %29, %23, %31 : vector<8x1xi1>, vector<8x1xf32>
    %33 = vector.shape_cast %32 : vector<8x1xf32> to vector<1x8x1xf32>
    %cst_16 = arith.constant dense<0.000000e+00> : vector<1xf32>
    %34 = vector.multi_reduction <add>, %33, %cst_16 [1, 2] : vector<1x8x1xf32> to vector<1xf32>
    %35 = vector.shape_cast %34 : vector<1xf32> to vector<1x1x1xf32>
    %36 = vector.extract %35[0, 0, 0] : f32 from vector<1x1x1xf32>
    %37 = vector.broadcast %36 : f32 to vector<1x1xf32>
    %38 = arith.addf %30, %37 : vector<1x1xf32>
    %c0_17 = arith.constant 0 : index
    %c0_18 = arith.constant 0 : index
    %39 = vector.load %arg5[%c0_17, %c0_18] : memref<1x1xf32, #tpu.memory_space<vmem>>, vector<1x1xf32>
    tpu.vector_store %arg5[%c0_17, %c0_18], %38 {strides = array<i32>} : memref<1x1xf32, #tpu.memory_space<vmem>>, vector<1x1xf32>,
    %c0_i32_19 = arith.constant 0 : i32
    %40 = arith.cmpi eq, %arg0, %c0_i32_19 : i32
    %41 = arith.extui %40 : i1 to i32
    %c0_i32_20 = arith.constant 0 : i32
    %42 = arith.cmpi ne, %41, %c0_i32_20 : i32
    scf.if %42 {
      %c0_21 = arith.constant 0 : index
      %c0_22 = arith.constant 0 : index
      %43 = vector.load %arg1[%c0_21, %c0_22] : memref<4x4xf32, #tpu.memory_space<vmem>>, vector<4x4xf32>
      %44 = vector.extract_strided_slice %43 {offsets = [0, 0], sizes = [2, 4], strides = [1, 1]} : vector<4x4xf32> to vector<2x4xf32>
      %45 = vector.extract_strided_slice %43 {offsets = [2, 0], sizes = [2, 4], strides = [1, 1]} : vector<4x4xf32> to vector<2x4xf32>
      %46 = math.log %44 : vector<2x4xf32>
      %cst_23 = arith.constant -1.000000e+02 : f32
      %47 = vector.broadcast %cst_23 : f32 to vector<2x4xf32>
      %48 = arith.maximumf %46, %47 : vector<2x4xf32>
      %cst_24 = arith.constant 1.000000e+00 : f32
      %49 = vector.broadcast %cst_24 : f32 to vector<2x4xf32>
      %50 = arith.subf %49, %44 : vector<2x4xf32>
      %51 = math.log %50 : vector<2x4xf32>
      %cst_25 = arith.constant -1.000000e+02 : f32
      %52 = vector.broadcast %cst_25 : f32 to vector<2x4xf32>
      %53 = arith.maximumf %51, %52 : vector<2x4xf32>
      %54 = arith.mulf %45, %48 : vector<2x4xf32>
      %cst_26 = arith.constant 1.000000e+00 : f32
      %55 = vector.broadcast %cst_26 : f32 to vector<2x4xf32>
      %56 = arith.subf %55, %45 : vector<2x4xf32>
      %57 = arith.mulf %56, %53 : vector<2x4xf32>
      %58 = arith.addf %54, %57 : vector<2x4xf32>
      %cst_27 = arith.constant 0.000000e+00 : f32
      %59 = vector.broadcast %cst_27 : f32 to vector<2x4xf32>
      %60 = arith.subf %59, %58 : vector<2x4xf32>
      %61 = vector.shape_cast %60 : vector<2x4xf32> to vector<1x2x4xf32>
      %cst_28 = arith.constant dense<0.000000e+00> : vector<1xf32>
      %62 = vector.multi_reduction <add>, %61, %cst_28 [1, 2] : vector<1x2x4xf32> to vector<1xf32>
      %63 = vector.shape_cast %62 : vector<1xf32> to vector<1x1x1xf32>
      %64 = vector.extract %63[0, 0, 0] : f32 from vector<1x1x1xf32>
      %65 = vector.broadcast %64 : f32 to vector<1x1xf32>
      %cst_29 = arith.constant 8.000000e+00 : f32
      %66 = vector.broadcast %cst_29 : f32 to vector<1x1xf32>
      %67 = arith.divf %65, %66 : vector<1x1xf32>
      %c0_30 = arith.constant 0 : index
      %c0_31 = arith.constant 0 : index
      %68 = vector.load %arg5[%c0_30, %c0_31] : memref<1x1xf32, #tpu.memory_space<vmem>>, vector<1x1xf32>
      %cst_32 = arith.constant 1.250000e-01 : f32
      %69 = vector.broadcast %cst_32 : f32 to vector<1x1xf32>
      %70 = arith.mulf %68, %69 : vector<1x1xf32>
      %cst_33 = arith.constant 9.99999974E-5 : f32
      %71 = vector.broadcast %cst_33 : f32 to vector<1x1xf32>
      %72 = arith.mulf %71, %70 : vector<1x1xf32>
      %73 = arith.addf %67, %72 : vector<1x1xf32>
      %c0_34 = arith.constant 0 : index
      %c0_35 = arith.constant 0 : index
      %74 = vector.load %arg4[%c0_34, %c0_35] : memref<1x1xf32, #tpu.memory_space<vmem>>, vector<1x1xf32>
      tpu.vector_store %arg4[%c0_34, %c0_35], %73 {strides = array<i32>} : memref<1x1xf32, #tpu.memory_space<vmem>>, vector<1x1xf32>,
    } else {
    }
    return
  }
  func.func @transform_0(%arg0: i32) -> (i32, i32) {
    %c0_i32 = arith.constant 0 : i32
    %c0_i32_0 = arith.constant 0 : i32
    %c0_i32_1 = arith.constant 0 : i32
    return %c0_i32, %c0_i32_0 : i32, i32
  }
  func.func @transform_1(%arg0: i32) -> (i32, i32, i32) {
    %c0_i32 = arith.constant 0 : i32
    %c0_i32_0 = arith.constant 0 : i32
    %c0_i32_1 = arith.constant 0 : i32
    return %arg0, %c0_i32, %c0_i32_0 : i32, i32, i32
  }
  func.func @transform_2(%arg0: i32) -> (i32, i32, i32) {
    %c0_i32 = arith.constant 0 : i32
    %c0_i32_0 = arith.constant 0 : i32
    %c0_i32_1 = arith.constant 0 : i32
    return %arg0, %c0_i32, %c0_i32_0 : i32, i32, i32
  }
  func.func @transform_3(%arg0: i32) -> (i32, i32) {
    %c0_i32 = arith.constant 0 : i32
    %c0_i32_0 = arith.constant 0 : i32
    %c0_i32_1 = arith.constant 0 : i32
    return %c0_i32, %c0_i32_0 : i32, i32
  }
}

</mosaic_0001>

<bundles_post_ra>
// kernel: tpu_custom_call.1
= control target key start
LH: loop header
LB: loop body
LE: loop exit
PB: predicated region body
PF: predicated region fallthrough
CT: control target
= control target key end

     0   :  { %vm37_vm0 = vcmask 1042432   ;;  %s479_s0 = inlined_call_operand.vmem [shape: f32[4,4], index: 0, kind: input, shape index: {}]   ;;  %s480_s1 = inlined_call_operand.vmem [shape: f32[8,3,128], index: 1, kind: input, shape index: {}]   ;;  %s481_s2 = inlined_call_operand.vmem [shape: f32[8,3,128], index: 2, kind: input, shape index: {}]   ;;  %s482_s3 = inlined_call_operand.hbm [shape: f32[1,1], index: 3, kind: output, shape index: {}]  }
   0x1   :  { %v29_v0 = vld [vmem:[%s481_s2] sm:$0x7]  ;;  %v30_v1 = vld [vmem:[%s481_s2 + $0x4] sm:$0x7]  ;;  %v31_v2 = vld [vmem:[%s481_s2 + $0x8] sm:$0x7] }
   0x2   :  { %v32_v3 = vld [vmem:[%s481_s2 + $0xc] sm:$0x7]  ;;  %v33_v4 = vld [vmem:[%s481_s2 + $0x10] sm:$0x7]  ;;  %v34_v5 = vld [vmem:[%s481_s2 + $0x14] sm:$0x7] }
   0x3   :  { %v35_v6 = vld [vmem:[%s481_s2 + $0x18] sm:$0x7]  ;;  %v36_v7 = vld [vmem:[%s481_s2 + $0x1c] sm:$0x7]  ;;  %v102_v8 = vsel %vm37_vm0, %v29_v0, 0.0  ;;  %v109_v9 = vsel %vm37_vm0, %v30_v1, 0.0 }
   0x4   :  { %v116_v10 = vsel %vm37_vm0, %v31_v2, 0.0  ;;  %v123_v11 = vsel %vm37_vm0, %v32_v3, 0.0  ;;  %v103_v12 = vrot.slane %v102_v8, 4  ;;  %v110_v13 = vrot.slane %v109_v9, 4 }
   0x5   :  { %v117_v14 = vrot.slane %v116_v10, 4  ;;  %v124_v15 = vrot.slane %v123_v11, 4  ;;  %v130_v16 = vsel %vm37_vm0, %v33_v4, 0.0  ;;  %v137_v17 = vsel %vm37_vm0, %v34_v5, 0.0 }
   0x6   :  { %v144_v18 = vsel %vm37_vm0, %v35_v6, 0.0  ;;  %v151_v19 = vsel %vm37_vm0, %v36_v7, 0.0  ;;  %v104_v20 = vadd.f32 %v103_v12, %v102_v8  ;;  %v111_v21 = vadd.f32 %v110_v13, %v109_v9 }
   0x7   :  { %v118_v22 = vadd.f32 %v117_v14, %v116_v10  ;;  %v125_v23 = vadd.f32 %v124_v15, %v123_v11  ;;  %v131_v24 = vrot.slane %v130_v16, 4  ;;  %v138_v25 = vrot.slane %v137_v17, 4 }
   0x8   :  { %v145_v26 = vrot.slane %v144_v18, 4  ;;  %v152_v27 = vrot.slane %v151_v19, 4  ;;  %v105_v28 = vrot.slane %v104_v20, 2  ;;  %v112_v29 = vrot.slane %v111_v21, 2 }
   0x9   :  { %v119_v30 = vrot.slane %v118_v22, 2  ;;  %v126_v31 = vrot.slane %v125_v23, 2  ;;  %v132_v32 = vadd.f32 %v131_v24, %v130_v16  ;;  %v139_v33 = vadd.f32 %v138_v25, %v137_v17 }
   0xa   :  { %v146_v34 = vadd.f32 %v145_v26, %v144_v18  ;;  %v153_v35 = vadd.f32 %v152_v27, %v151_v19 }
   0xb   :  { %8 = vsyncpa [#allocation4], 0  ;;  %v106_v36 = vadd.f32 %v105_v28, %v104_v20  ;;  %v113_v37 = vadd.f32 %v112_v29, %v111_v21  ;;  %v120_v38 = vadd.f32 %v119_v30, %v118_v22  ;;  %v127_v39 = vadd.f32 %v126_v31, %v125_v23  ;;  %v21_v3 = vld [vmem:[%s480_s1] sm:$0x7]  ;;  %v22_v5 = vld [vmem:[%s480_s1 + $0x4] sm:$0x7] }
   0xc   :  { %v133_v40 = vrot.slane %v132_v32, 2  ;;  %v140_v41 = vrot.slane %v139_v33, 2  ;;  %v147_v42 = vrot.slane %v146_v34, 2  ;;  %v154_v43 = vrot.slane %v153_v35, 2  ;;  %v23_v6 = vld [vmem:[%s480_s1 + $0x8] sm:$0x7] }
   0xd   :  { %v107_v44 = vrot.slane %v106_v36, 1  ;;  %v114_v45 = vrot.slane %v113_v37, 1  ;;  %v121_v46 = vrot.slane %v120_v38, 1  ;;  %v128_v47 = vrot.slane %v127_v39, 1  ;;  %v24_v16 = vld [vmem:[%s480_s1 + $0xc] sm:$0x7] }
   0xe   :  { %vm182_vm1 = vcmask 1041409   ;;  %v134_v48 = vadd.f32 %v133_v40, %v132_v32  ;;  %v141_v49 = vadd.f32 %v140_v41, %v139_v33  ;;  %v148_v50 = vadd.f32 %v147_v42, %v146_v34  ;;  %v25_v20 = vld [vmem:[%s480_s1 + $0x10] sm:$0x7]  ;;  %v26_v27 = vld [vmem:[%s480_s1 + $0x14] sm:$0x7]  ;;  %s362_s18 = smov [#allocation3]  }
   0xf   :  { %v155_v51 = vadd.f32 %v154_v43, %v153_v35  ;;  %v108_v52 = vadd.f32 %v107_v44, %v106_v36  ;;  %v115_v53 = vadd.f32 %v114_v45, %v113_v37  ;;  %v122_v54 = vadd.f32 %v121_v46, %v120_v38  ;;  %v27_v40 = vld [vmem:[%s480_s1 + $0x18] sm:$0x7]  ;;  %s315_s19 = sshll.u32 %s362_s18, 4  ;;  %s316_s19 = int_to_ptr.vmem [resolvable:$true] %s315_s19 }
  0x10   :  { %v129_v55 = vadd.f32 %v128_v47, %v127_v39  ;;  %v135_v56 = vrot.slane %v134_v48, 1  ;;  %v142_v57 = vrot.slane %v141_v49, 1  ;;  %v149_v58 = vrot.slane %v148_v50, 1  ;;  %s337_s20 = scalar_lea.vmem %s316_s19, 16  ;;  %s341_s21 = scalar_lea.vmem %s316_s19, 32 }
  0x11   :  { %v156_v59 = vrot.slane %v155_v51, 1  ;;  %v158_v60 = vmul.f32 0.33333334, %v108_v52  ;;  %v159_v61 = vmul.f32 0.33333334, %v115_v53  ;;  %vm184_vm2 = vcmask 1042434   ;;  %p338_p0 = scmp.ne.s32.totalorder %s316_s19, %s337_s20  ;;  %p342_p1 = scmp.lt.s32.totalorder %s316_s19, %s316_s19 }
  0x12   :  { %v160_v62 = vmul.f32 0.33333334, %v122_v54  ;;  %v136_v63 = vadd.f32 %v135_v56, %v134_v48  ;;  %v143_v0 = vadd.f32 %v142_v57, %v141_v49  ;;  %v150_v1 = vadd.f32 %v149_v58, %v148_v50  ;;  %v28_v49 = vld [vmem:[%s480_s1 + $0x1c] sm:$0x7]  ;;  %p343_p2 = scmp.lt.s32.totalorder %s341_s21, %s337_s20 }
  0x13   :  { %v157_v2 = vadd.f32 %v156_v59, %v155_v51  ;;  %v161_v4 = vmul.f32 0.33333334, %v129_v55  ;;  %vm186_vm3 = vcmask 1043459   ;;  %vm188_vm4 = vcmask 1044484  }
  0x14   :  { %v162_v7 = vmul.f32 0.33333334, %v136_v63  ;;  %v163_v8 = vmul.f32 0.33333334, %v143_v0  ;;  %v164_v9 = vmul.f32 0.33333334, %v150_v1  ;;  %v206_v10 = vmul.f32 %v158_v60, %v158_v60  ;;  %p344_p3 = por %p343_p2, %p342_p1 }
  0x15   :  { %v165_v11 = vmul.f32 0.33333334, %v157_v2  ;;  %vm190_vm5 = vcmask 1045509   ;;  %vm192_vm6 = vcmask 1046534   ;;  %vm194_vm7 = vcmask 1047559  }
  0x16   :  { %v207_v12 = vmul.f32 %v159_v61, %v159_v61  ;;  %v208_v13 = vmul.f32 %v160_v62, %v160_v62  ;;  %v209_v14 = vmul.f32 %v161_v4, %v161_v4  ;;  %v210_v15 = vmul.f32 %v162_v7, %v162_v7  ;;  %p345_p4 = pnand %p344_p3, %p338_p0 }
  0x17   :  { %v211_v17 = vmul.f32 %v163_v8, %v163_v8  ;;  %v212_v18 = vmul.f32 %v164_v9, %v164_v9  ;;  %v213_v19 = vmul.f32 %v165_v11, %v165_v11  ;;  %v38_v21 = vsel %vm37_vm0, %v21_v3, 0.0 }
  0x18   :  { %v222_v22 = vsel %vm182_vm1, %v207_v12, %v206_v10  ;;  %v39_v23 = vrot.slane %v38_v21, 4  ;;  %v45_v24 = vsel %vm37_vm0, %v22_v5, 0.0  ;;  %v52_v25 = vsel %vm37_vm0, %v23_v6, 0.0 }
  0x19   :  { %v223_v26 = vsel %vm184_vm2, %v208_v13, %v222_v22  ;;  %v46_v28 = vrot.slane %v45_v24, 4  ;;  %v53_v29 = vrot.slane %v52_v25, 4  ;;  %v59_v30 = vsel %vm37_vm0, %v24_v16, 0.0 }
  0x1a   :  { %v224_v31 = vsel %vm186_vm3, %v209_v14, %v223_v26  ;;  %v40_v32 = vadd.f32 %v39_v23, %v38_v21  ;;  %v60_v33 = vrot.slane %v59_v30, 4  ;;  %v66_v34 = vsel %vm37_vm0, %v25_v20, 0.0 }
  0x1b   :  { %v225_v35 = vsel %vm188_vm4, %v210_v15, %v224_v31  ;;  %v47_v36 = vadd.f32 %v46_v28, %v45_v24  ;;  %v54_v37 = vadd.f32 %v53_v29, %v52_v25  ;;  %v67_v38 = vrot.slane %v66_v34, 4 }
  0x1c   :  { %v226_v39 = vsel %vm190_vm5, %v211_v17, %v225_v35  ;;  %v41_v41 = vrot.slane %v40_v32, 2  ;;  %v61_v42 = vadd.f32 %v60_v33, %v59_v30  ;;  %v73_v43 = vsel %vm37_vm0, %v26_v27, 0.0 }
  0x1d   :  { %v227_v44 = vsel %vm192_vm6, %v212_v18, %v226_v39  ;;  %v48_v45 = vrot.slane %v47_v36, 2  ;;  %v55_v46 = vrot.slane %v54_v37, 2  ;;  %v68_v47 = vadd.f32 %v67_v38, %v66_v34 }
  0x1e   :  { %v228_v48 = vsel %vm194_vm7, %v213_v19, %v227_v44  ;;  %v42_v50 = vadd.f32 %v41_v41, %v40_v32  ;;  %v62_v51 = vrot.slane %v61_v42, 2  ;;  %v74_v52 = vrot.slane %v73_v43, 4 }
  0x1f   :  { %230 = vadd.xlane.f32.xlu0 %v228_v48  ;;  %v49_v53 = vadd.f32 %v48_v45, %v47_v36  ;;  %v56_v54 = vadd.f32 %v55_v46, %v54_v37  ;;  %v69_v55 = vrot.slane %v68_v47, 2  ;;  %v80_v56 = vsel %vm37_vm0, %v27_v40, 0.0  ;;  %v269_v46 = vld [vmem:[%s479_s0] sm:$0xf] }
  0x20   :  { %v43_v57 = vrot.slane %v42_v50, 1  ;;  %v63_v58 = vadd.f32 %v62_v51, %v61_v42  ;;  %v75_v59 = vadd.f32 %v74_v52, %v73_v43  ;;  %v81_v60 = vrot.slane %v80_v56, 4 }
  0x21   :  { %v50_v61 = vrot.slane %v49_v53, 1  ;;  %v57_v62 = vrot.slane %v56_v54, 1  ;;  %v70_v63 = vadd.f32 %v69_v55, %v68_v47  ;;  %v87_v0 = vsel %vm37_vm0, %v28_v49, 0.0 }
  0x22   :  { %v44_v1 = vadd.f32 %v43_v57, %v42_v50  ;;  %v64_v2 = vrot.slane %v63_v58, 1  ;;  %v76_v3 = vrot.slane %v75_v59, 2  ;;  %v82_v4 = vadd.f32 %v81_v60, %v80_v56 }
  0x23   :  { %v51_v5 = vadd.f32 %v50_v61, %v49_v53  ;;  %v58_v6 = vadd.f32 %v57_v62, %v56_v54  ;;  %v71_v7 = vrot.slane %v70_v63, 1  ;;  %v88_v8 = vrot.slane %v87_v0, 4 }
  0x24   :  { %v65_v9 = vadd.f32 %v64_v2, %v63_v58  ;;  %v77_v10 = vadd.f32 %v76_v3, %v75_v59  ;;  %v83_v11 = vrot.slane %v82_v4, 2  ;;  %v94_v12 = vmul.f32 0.33333334, %v44_v1 }
  0x25   :  { %v72_v13 = vadd.f32 %v71_v7, %v70_v63  ;;  %v89_v14 = vadd.f32 %v88_v8, %v87_v0  ;;  %v95_v15 = vmul.f32 0.33333334, %v51_v5  ;;  %v96_v16 = vmul.f32 0.33333334, %v58_v6 }
  0x26   :  { %v78_v17 = vrot.slane %v77_v10, 1  ;;  %v84_v18 = vadd.f32 %v83_v11, %v82_v4  ;;  %v97_v19 = vmul.f32 0.33333334, %v65_v9  ;;  %v166_v20 = vmul.f32 %v94_v12, %v94_v12 }
  0x27   :  { %v90_v21 = vrot.slane %v89_v14, 2  ;;  %v98_v22 = vmul.f32 0.33333334, %v72_v13  ;;  %v167_v23 = vmul.f32 %v95_v15, %v95_v15  ;;  %v168_v24 = vmul.f32 %v96_v16, %v96_v16 }
  0x28   :  { %v79_v25 = vadd.f32 %v78_v17, %v77_v10  ;;  %v85_v26 = vrot.slane %v84_v18, 1  ;;  %v169_v27 = vmul.f32 %v97_v19, %v97_v19  ;;  %v273_v47 = vsub.f32 1.0, %v269_v46 }
  0x29   :  { %v91_v28 = vadd.f32 %v90_v21, %v89_v14  ;;  %v170_v29 = vmul.f32 %v98_v22, %v98_v22  ;;  %v183_v30 = vsel %vm182_vm1, %v167_v23, %v166_v20  ;;  %329 = vlog2.f32 %v269_v46 }
  0x2a   :  { %v86_v31 = vadd.f32 %v85_v26, %v84_v18  ;;  %v99_v32 = vmul.f32 0.33333334, %v79_v25  ;;  %v185_v33 = vsel %vm184_vm2, %v168_v24, %v183_v30  ;;  %331 = vlog2.f32 %v273_v47 }
  0x2b   :  { %v92_v34 = vrot.slane %v91_v28, 1  ;;  %v187_v35 = vsel %vm186_vm3, %v169_v27, %v185_v33  ;;  %vm251_vm12 = vcmask 7168   ;;  %vm290_vm13 = vcmask 25600  }
  0x2c   :  { %v100_v36 = vmul.f32 0.33333334, %v86_v31  ;;  %v171_v37 = vmul.f32 %v99_v32, %v99_v32  ;;  %v189_v38 = vsel %vm188_vm4, %v170_v29, %v187_v35  ;;  %vm19_vm14 = vcmask 0  }
  0x2d   :  { %v93_v39 = vadd.f32 %v92_v34, %v91_v28  ;;  %v361_v15 = vmov 0.0  }
  0x2e   :  { %v172_v40 = vmul.f32 %v100_v36, %v100_v36  ;;  %v191_v41 = vsel %vm190_vm5, %v171_v37, %v189_v38  ;;  %20 = vst.msk [vmem:[#allocation2] sm:$0x1] %vm19_vm14, %v361_v15 }
  0x2f   :  { %v101_v42 = vmul.f32 0.33333334, %v93_v39 }
  0x30   :  { %v193_v43 = vsel %vm192_vm6, %v172_v40, %v191_v41 }
  0x31   :  { %v173_v44 = vmul.f32 %v101_v42, %v101_v42 }
  0x33   :  { %v195_v45 = vsel %vm194_vm7, %v173_v44, %v193_v43  ;;  %v330_v49 = vpop.eup %329 }
  0x34   :  { %197 = vadd.xlane.f32.xlu0 %v195_v45  ;;  %v332_v50 = vpop.eup %331  ;;  %v271_v51 = vmul.f32 0.6931472, %v330_v49 }
  0x35   :  { %v275_v52 = vmul.f32 0.6931472, %v332_v50  ;;  %v249_v30 = vld [vmem:[#allocation2] sm:$0x1] }
  0x36   :  { %v272_v55 = vmax.f32 %v271_v51, -100.0 }
  0x37   :  { %v276_v56 = vmax.f32 %v275_v52, -100.0 }
  0x38   :  { %v278_v59 = vrot.slane %v272_v55, 6 }
  0x39   :  { %v282_v60 = vrot.slane %v276_v56, 6 }
  0x3a   :  { %v280_v63 = vmul.f32 %v278_v59, %v269_v46 }
  0x3b   :  { %v284_v0 = vmul.f32 %v282_v60, %v273_v47 }
  0x3d   :  { %v285_v2 = vadd.f32 %v284_v0, %v280_v63 }
  0x3f   :  { %v286_v8 = vsub.f32 0.0, %v285_v2 }
  0x41   :  { %v288_v12 = vrot.slane %v286_v8, 2 }
  0x43   :  { %v291_v14 = vsel %vm290_vm13, %v288_v12, 0.0 }
  0xac   :  { %v231_v48 = vpop.xlane.xlu0 %230 }
  0xad   :  { %333 = vrsqrt.f32 %v231_v48  ;;  %vm234_vm8 = vcmp.eq.f32.partialorder %v231_v48, inf  ;;  %v237_v61 = vand.u32 2147483648, %v231_v48  ;;  %vm236_vm9 = vcmp.eq.f32.partialorder %v231_v48, 0.0 }
  0xb7   :  { %v334_v53 = vpop.eup %333 }
  0xb8   :  { %v233_v54 = vmul.f32 %v334_v53, %v231_v48 }
  0xba   :  { %v235_v58 = vsel %vm234_vm8, %v231_v48, %v233_v54 }
  0xbb   :  { %v238_v62 = vsel %vm236_vm9, %v237_v61, %v235_v58 }
  0xbc   :  { %v239_v1 = vsub.f32 100.0, %v238_v62 }
  0xbe   :  { %v240_v5 = vand.u32 2147483647, %v239_v1 }
  0xc1   :  { %v198_v57 = vpop.xlane.xlu0 %197 }
  0xc2   :  { %335 = vrsqrt.f32 %v198_v57  ;;  %vm201_vm10 = vcmp.eq.f32.partialorder %v198_v57, inf  ;;  %v204_v6 = vand.u32 2147483648, %v198_v57  ;;  %vm203_vm11 = vcmp.eq.f32.partialorder %v198_v57, 0.0 }
  0xcc   :  { %v336_v3 = vpop.eup %335 }
  0xcd   :  { %v200_v4 = vmul.f32 %v336_v3, %v198_v57 }
  0xcf   :  { %v202_v7 = vsel %vm201_vm10, %v198_v57, %v200_v4 }
  0xd0   :  { %v205_v9 = vsel %vm203_vm11, %v204_v6, %v202_v7 }
  0xd1   :  { %v241_v10 = vadd.f32 %v240_v5, %v205_v9 }
  0xd3   :  { %v242_v11 = vmul.f32 %v241_v10, %v241_v10 }
  0xd5   :  { %v252_v13 = vsel %vm251_vm12, %v242_v11, 0.0 }
  0xd6   :  { %253 = vadd.xlane.f32.xlu1 %v252_v13 }
  0xda   :  { %292 = vadd.xlane.f32.xlu1 %v291_v14 }
 0x163   :  { %v254_v16 = vpop.xlane.xlu1 %253 }
 0x164   :  { %v255_v17 = vrot.slane %v254_v16, 4 }
 0x166   :  { %v256_v18 = vadd.f32 %v255_v17, %v254_v16 }
 0x167   :  { %v293_v19 = vpop.xlane.xlu1 %292 }
 0x168   :  { %v257_v20 = vrot.slane %v256_v18, 2  ;;  %v294_v21 = vrot.slane %v293_v19, 4 }
 0x16a   :  { %v295_v22 = vadd.f32 %v294_v21, %v293_v19  ;;  %v258_v23 = vadd.f32 %v257_v20, %v256_v18 }
 0x16c   :  { %v296_v24 = vrot.slane %v295_v22, 2  ;;  %v259_v25 = vrot.slane %v258_v23, 1 }
 0x16e   :  { %v297_v26 = vadd.f32 %v296_v24, %v295_v22  ;;  %v260_v27 = vadd.f32 %v259_v25, %v258_v23 }
 0x170   :  { %323 = vpush %v260_v27  ;;  %v298_v28 = vrot.slane %v297_v26, 1 }
 0x172   :  { %v299_v29 = vadd.f32 %v298_v28, %v297_v26 }
 0x174   :  { %325 = vpush %v299_v29 }
 0x1a1   :  { %s324_s0 = spop %323 }
 0x1a2   :  { %v262_v31 = vstv %s324_s0 }
 0x1a3   :  { %v263_v32 = vadd.f32 %v262_v31, %v249_v30 }
 0x1a5   :  { %265 = vst.msk [vmem:[#allocation2] sm:$0x1] %vm19_vm14, %v263_v32  ;;  %s326_s17 = spop %325 }
 0x1a6   :  { %v301_v33 = vstv %s326_s17 }
 0x1a7   :  { %v303_v36 = vmul.f32 0.125, %v301_v33 }
 0x1ac   :  { %v304_v34 = vld [vmem:[#allocation2] sm:$0x1] }
 0x1ad   :  { %v305_v35 = vmul.f32 0.125, %v304_v34 }
 0x1af   :  { %v306_v37 = vmul.f32 0.0001, %v305_v35 }
 0x1b1   :  { %v307_v38 = vadd.f32 %v306_v37, %v303_v36 }
 0x1b3   :  { %308 = vst.msk [vmem:[#allocation3] sm:$0x1] %vm19_vm14, %v307_v38 }
 0x1b4   :  { %348 = shalt.err (!%p345_p4)
}
 0x1b5   :  { %s349_s24 = scalar_lea.hbm %s482_s3, 16 }
 0x1b6   :  { %p350_p5 = scmp.ne.s32.totalorder %s482_s3, %s349_s24  ;;  %p353_p6 = scmp.lt.u32.totalorder %s349_s24, %s482_s3 }
 0x1b8   :  { %p355_p7 = pnand %p353_p6, %p350_p5 }
 0x1ba   :  { %358 = shalt.err (!%p355_p7)
}
 0x1bb   :  { %318 = dma.vmem_to_hbm [thread:$0]  %s316_s19, 16, %s482_s3, [#allocation4]  }
 0x1bc   :  { %359 = dma.done.wait [#allocation4], 16  }
 0x1bd   :  { %360 = vsyncadd [#allocation4], 4294967280 }
 0x1be   :  { %322 = vsyncpa [#allocation4], 1 }

</bundles_post_ra>
